<compile_context>
chip_gen: v7x
topology: tpu7x:2x2x1
jax: 0.10.0
libtpu: 0.0.40
codegen_flags: <defaults>
</compile_context>

<pallas_src>
import functools

import jax
import jax.numpy as jnp
from jax.experimental import pallas as pl
from jax.experimental.pallas import tpu as pltpu

N_NODES = 16
NUM_FEAT = 32
HIDDEN_DIM = 32
NUM_LAYERS = 2
NUM_GRAPHS = 4


# ----------------------------- Pallas kernel -------------------------------

def make_gconv_kernel(layer_dims, act_fn, matmul_dtype):
    """Fused multi-layer GCN kernel for one graph (one grid step).

    layer_dims: static tuple of (in_dim, out_dim) per layer, used to slice the
    packed weight/bias slabs with static indices.
    """

    def kernel(src_ref, dst_ref, ew_ref, x_ref, w_ref, b_ref, o_ref):
        n = o_ref.shape[0]
        e = src_ref.shape[1]

        src = src_ref[...]                                    # [1, E] int32
        dst = dst_ref[...]                                    # [1, E] int32
        w = ew_ref[...]                                       # [1, E] f32 (self loops included)

        # one-hot incidence factors (exact even in bf16)
        node_ids = jax.lax.broadcasted_iota(jnp.int32, (n, e), 0)
        d1 = (node_ids == dst).astype(jnp.float32)            # [N, E]: i == dst_e
        s1 = (node_ids == src).astype(jnp.float32)            # [N, E]: j == src_e

        dw = d1 * w                                           # [N, E]
        # deg[i] = sum_{e: dst_e == i} w_e   (PyG gcn_norm: degree at target)
        deg = jnp.sum(dw, axis=1, keepdims=True)              # [N, 1]
        # self loops guarantee deg >= 1, so no isolated-node guard is needed
        dinv = jax.lax.rsqrt(deg)                             # [N, 1]  (EUP)

        # Normalized adjacency in ONE MXU contraction over the edge axis:
        #   A_norm[i, j] = dinv[i] * (sum_e w_e [i==dst_e][j==src_e]) * dinv[j]
        # Only cheap row-scalings feed the MXU -- no [N,N] elementwise pass,
        # no transpose, and nothing normalization-related left in the layers.
        a_norm = jax.lax.dot_general(
            (dw * dinv).astype(matmul_dtype),
            (s1 * dinv).astype(matmul_dtype),
            (((1,), (1,)), ((), ())),
            preferred_element_type=jnp.float32)               # [N, N] f32
        a_mm = a_norm.astype(matmul_dtype)

        # ---- fused GCN layers: z = act( A_norm (z W) + b ) ----------------
        z = x_ref[...]                                        # [N, F] f32
        col = 0
        for (din, dout) in layer_dims:
            w_l = w_ref[0:din, col:col + dout].astype(matmul_dtype)   # static slab slice
            b_l = b_ref[0:1, col:col + dout]                          # [1, out] f32
            zw = jnp.dot(z.astype(matmul_dtype), w_l,
                         preferred_element_type=jnp.float32)          # [N, out]
            msg = jnp.dot(a_mm, zw.astype(matmul_dtype),
                          preferred_element_type=jnp.float32)         # [N, out]
            z = act_fn(msg + b_l)                                     # f32 epilogue (v5e-safe)
            col += dout

        o_ref[...] = z.astype(o_ref.dtype)

    return kernel


# ------------------------------- wrapper ------------------------------------

class GConvPallas:
    """Pallas port of GConv(input_dim, hidden_dim, activation=ReLU, num_layers)."""

    def __init__(self, key, input_dim, hidden_dim, num_layers,
                 activation=lambda h: jnp.maximum(h, 0.0),
                 matmul_dtype=jnp.float32):
        self.input_dim = input_dim
        self.hidden_dim = hidden_dim
        self.num_layers = num_layers
        self.act_fn = activation
        self.matmul_dtype = matmul_dtype

        dims = []
        in_dim = input_dim
        for _ in range(num_layers):
            dims.append((in_dim, hidden_dim))
            in_dim = hidden_dim
        self.layer_dims = tuple(dims)

        # pack all layer params into one lane-dense slab each (single DMA)
        max_in = max(d for d, _ in self.layer_dims)
        total_out = sum(o for _, o in self.layer_dims)
        w_slab = jnp.zeros((max_in, total_out), jnp.float32)
        b_slab = jnp.zeros((1, total_out), jnp.float32)      # GCNConv bias init: zeros
        keys = jax.random.split(key, num_layers)
        col = 0
        for layer, (din, dout) in enumerate(self.layer_dims):
            # GCNConv: glorot-uniform weight stored [in, out] so y = x @ W + b
            limit = float(jnp.sqrt(6.0 / jnp.float32(din + dout)))
            w = jax.random.uniform(keys[layer], (din, dout),
                                   jnp.float32, -limit, limit)
            w_slab = w_slab.at[0:din, col:col + dout].set(w)
            col += dout
        self.w_slab = w_slab
        self.b_slab = b_slab

        self._kernel = make_gconv_kernel(self.layer_dims, activation, matmul_dtype)

    # everything (edge prep + pallas_call) under one jit -> one dispatch
    @functools.partial(jax.jit, static_argnums=0)
    def _apply(self, x_b, edge_index_b, edge_weight_b, w_slab, b_slab):
        g, n, f = x_b.shape
        e0 = edge_index_b.shape[-1]
        h = self.hidden_dim

        # --- add_remaining_self_loops (PyG gcn_norm, fill value 1) ----------
        # keep existing self-loop weights; add weight-1 loops only where missing
        src0 = edge_index_b[:, 0, :]                          # [G, E0] (row = source)
        dst0 = edge_index_b[:, 1, :]                          # [G, E0] (col = target)
        ids = jnp.arange(n, dtype=jnp.int32)
        self_mask = src0 == dst0                              # [G, E0]
        has_self = jnp.any((src0[:, :, None] == ids) & self_mask[:, :, None],
                           axis=1)                            # [G, N]
        loop_w = jnp.where(has_self, 0.0, 1.0).astype(jnp.float32)
        ids_b = jnp.broadcast_to(ids, (g, n))
        src = jnp.concatenate([src0, ids_b], axis=1)          # [G, E0+N]
        dst = jnp.concatenate([dst0, ids_b], axis=1)
        ew = jnp.concatenate([edge_weight_b, loop_w], axis=1)
        e = e0 + n
        src = src.reshape(g, 1, e)
        dst = dst.reshape(g, 1, e)
        ew = ew.reshape(g, 1, e)

        edge_spec = pl.BlockSpec((None, 1, e), lambda i: (i, 0, 0))
        return pl.pallas_call(
            self._kernel,
            out_shape=jax.ShapeDtypeStruct((g, n, h), jnp.float32),
            grid=(g,),
            in_specs=[
                edge_spec,                                        # src
                edge_spec,                                        # dst
                edge_spec,                                        # edge weight
                pl.BlockSpec((None, n, f), lambda i: (i, 0, 0)),  # x per graph
                pl.BlockSpec(w_slab.shape, lambda i: (0, 0)),     # weight slab (resident)
                pl.BlockSpec(b_slab.shape, lambda i: (0, 0)),     # bias slab (resident)
            ],
            out_specs=pl.BlockSpec((None, n, h), lambda i: (i, 0, 0)),
            compiler_params=pltpu.CompilerParams(
                dimension_semantics=("parallel",)),  # graphs shard across TCs on v7x
        )(src, dst, ew, x_b, w_slab, b_slab)

    def forward_batched(self, x_b, edge_index_b, edge_weight_b=None):
        """x_b: [G, N, F], edge_index_b: [G, 2, E0], edge_weight_b: [G, E0] or None."""
        g = x_b.shape[0]
        e0 = edge_index_b.shape[-1]
        if edge_weight_b is None:
            edge_weight_b = jnp.ones((g, e0), jnp.float32)
        return self._apply(x_b.astype(jnp.float32),
                           edge_index_b.astype(jnp.int32),
                           edge_weight_b.astype(jnp.float32),
                           self.w_slab, self.b_slab)

    def forward(self, x, edge_index, edge_weight=None):
        """Single-graph module interface (G=1 case of the batched call)."""
        ew_b = None if edge_weight is None else edge_weight[None]
        return self.forward_batched(x[None], edge_index[None], ew_b)[0]


# ----------------------------------- main -----------------------------------

if __name__ == "__main__":
    key = jax.random.PRNGKey(0)
    k_x, k_xb, k_model = jax.random.split(key, 3)

    # small deterministic graph: bidirectional ring over 16 nodes (E0 = 32)
    s = jnp.arange(N_NODES, dtype=jnp.int32)
    d = (s + 1) % N_NODES
    edge_index = jnp.concatenate(
        [jnp.stack([s, d]), jnp.stack([d, s])], axis=1).astype(jnp.int32)  # [2, 32]

    x = jax.random.normal(k_x, (N_NODES, NUM_FEAT), jnp.float32)

    model = GConvPallas(k_model, NUM_FEAT, HIDDEN_DIM, NUM_LAYERS)

    # single-graph forward (matches the PyTorch module's interface)
    z = model.forward(x, edge_index)
    jax.block_until_ready(z)
    assert z.shape == (N_NODES, HIDDEN_DIM)
    assert bool(jnp.all(jnp.isfinite(z)))
    assert bool(jnp.all(z >= 0.0))          # ReLU applied after every layer

    # graph-batched forward: one pallas_call, grid=(G,), parallel over graphs
    x_b = jnp.concatenate(
        [x[None],
         jax.random.normal(k_xb, (NUM_GRAPHS - 1, N_NODES, NUM_FEAT), jnp.float32)],
        axis=0)
    edge_index_b = jnp.tile(edge_index[None], (NUM_GRAPHS, 1, 1))
    z_b = model.forward_batched(x_b, edge_index_b)
    jax.block_until_ready(z_b)
    assert z_b.shape == (NUM_GRAPHS, N_NODES, HIDDEN_DIM)
    assert bool(jnp.all(jnp.isfinite(z_b)))
    assert bool(jnp.allclose(z_b[0], z, atol=1e-5, rtol=1e-5))

    print("KERNEL_OK")
</pallas_src>

<mosaic_0001>
module attributes {stable_mosaic.version = 11 : i64} {
  func.func @kernel(%arg0: i32, %arg1: memref<1x1x48xi32, #tpu.memory_space<vmem>>, %arg2: memref<1x1x48xi32, #tpu.memory_space<vmem>>, %arg3: memref<1x1x48xf32, #tpu.memory_space<vmem>>, %arg4: memref<1x16x32xf32, #tpu.memory_space<vmem>>, %arg5: memref<32x64xf32, #tpu.memory_space<vmem>>, %arg6: memref<1x64xf32, #tpu.memory_space<vmem>>, %arg7: memref<1x16x32xf32, #tpu.memory_space<vmem>>) attributes {dimension_semantics = [#tpu.dimension_semantics<parallel>], iteration_bounds = array<i64: 1>, scalar_prefetch = 0 : i64, scratch_operands = 0 : i64, tpu.core_type = #tpu.core_type<tc>, window_params = [{transform_indices = @transform_0, window_bounds = array<i64: 1, 1, 48>}, {transform_indices = @transform_1, window_bounds = array<i64: 1, 1, 48>}, {transform_indices = @transform_2, window_bounds = array<i64: 1, 1, 48>}, {transform_indices = @transform_3, window_bounds = array<i64: 1, 16, 32>}, {pipeline_mode = #tpu.pipeline_mode<synchronous>, transform_indices = @transform_4, window_bounds = array<i64: 32, 64>}, {pipeline_mode = #tpu.pipeline_mode<synchronous>, transform_indices = @transform_5, window_bounds = array<i64: 1, 64>}, {transform_indices = @transform_6, window_bounds = array<i64: 1, 16, 32>}]} {
    %c0 = arith.constant 0 : index
    %c0_0 = arith.constant 0 : index
    %c0_1 = arith.constant 0 : index
    %0 = vector.load %arg1[%c0, %c0_0, %c0_1] : memref<1x1x48xi32, #tpu.memory_space<vmem>>, vector<1x1x48xi32>
    %1 = vector.shape_cast %0 : vector<1x1x48xi32> to vector<1x48xi32>
    %c0_2 = arith.constant 0 : index
    %c0_3 = arith.constant 0 : index
    %c0_4 = arith.constant 0 : index
    %2 = vector.load %arg2[%c0_2, %c0_3, %c0_4] : memref<1x1x48xi32, #tpu.memory_space<vmem>>, vector<1x1x48xi32>
    %3 = vector.shape_cast %2 : vector<1x1x48xi32> to vector<1x48xi32>
    %c0_5 = arith.constant 0 : index
    %c0_6 = arith.constant 0 : index
    %c0_7 = arith.constant 0 : index
    %4 = vector.load %arg3[%c0_5, %c0_6, %c0_7] : memref<1x1x48xf32, #tpu.memory_space<vmem>>, vector<1x1x48xf32>
    %5 = vector.shape_cast %4 : vector<1x1x48xf32> to vector<1x48xf32>
    %6 = tpu.iota {dimensions = array<i32: 0>} : vector<16x48xi32>
    %7 = vector.broadcast %3 : vector<1x48xi32> to vector<16x48xi32>
    %8 = arith.cmpi eq, %6, %7 : vector<16x48xi32>
    %9 = arith.extui %8 : vector<16x48xi1> to vector<16x48xi32>
    %10 = arith.sitofp %9 : vector<16x48xi32> to vector<16x48xf32>
    %11 = vector.broadcast %1 : vector<1x48xi32> to vector<16x48xi32>
    %12 = arith.cmpi eq, %6, %11 : vector<16x48xi32>
    %13 = arith.extui %12 : vector<16x48xi1> to vector<16x48xi32>
    %14 = arith.sitofp %13 : vector<16x48xi32> to vector<16x48xf32>
    %15 = vector.broadcast %5 : vector<1x48xf32> to vector<16x48xf32>
    %16 = arith.mulf %10, %15 : vector<16x48xf32>
    %cst = arith.constant dense<0.000000e+00> : vector<16xf32>
    %17 = vector.multi_reduction <add>, %16, %cst [1] : vector<16x48xf32> to vector<16xf32>
    %18 = vector.shape_cast %17 : vector<16xf32> to vector<16x1xf32>
    %19 = math.rsqrt %18 : vector<16x1xf32>
    %20 = vector.broadcast %19 : vector<16x1xf32> to vector<16x48xf32>
    %21 = arith.mulf %16, %20 : vector<16x48xf32>
    %22 = vector.broadcast %19 : vector<16x1xf32> to vector<16x48xf32>
    %23 = arith.mulf %14, %22 : vector<16x48xf32>
    %cst_8 = arith.constant dense<0.000000e+00> : vector<16x16xf32>
    %24 = tpu.matmul %21, %23, %cst_8 {dimension_numbers = #tpu.dot_dimension_numbers<[1], [1], [0], [0], [0, 0, 1, 0], [], []>} : vector<16x48xf32>, vector<16x48xf32>, vector<16x16xf32> -> vector<16x16xf32>
    %c0_9 = arith.constant 0 : index
    %c0_10 = arith.constant 0 : index
    %c0_11 = arith.constant 0 : index
    %25 = vector.load %arg4[%c0_9, %c0_10, %c0_11] : memref<1x16x32xf32, #tpu.memory_space<vmem>>, vector<1x16x32xf32>
    %26 = vector.shape_cast %25 : vector<1x16x32xf32> to vector<16x32xf32>
    %c0_12 = arith.constant 0 : index
    %c0_13 = arith.constant 0 : index
    %27 = vector.load %arg5[%c0_12, %c0_13] : memref<32x64xf32, #tpu.memory_space<vmem>>, vector<32x32xf32>
    %c0_14 = arith.constant 0 : index
    %c0_15 = arith.constant 0 : index
    %28 = vector.load %arg6[%c0_14, %c0_15] : memref<1x64xf32, #tpu.memory_space<vmem>>, vector<1x32xf32>
    %cst_16 = arith.constant dense<0.000000e+00> : vector<16x32xf32>
    %29 = tpu.matmul %26, %27, %cst_16 {dimension_numbers = #tpu.dot_dimension_numbers<[1], [0], [0], [1], [0, 0, 1, 1], [], []>} : vector<16x32xf32>, vector<32x32xf32>, vector<16x32xf32> -> vector<16x32xf32>
    %cst_17 = arith.constant dense<0.000000e+00> : vector<16x32xf32>
    %30 = tpu.matmul %24, %29, %cst_17 {dimension_numbers = #tpu.dot_dimension_numbers<[1], [0], [0], [1], [0, 0, 1, 1], [], []>} : vector<16x16xf32>, vector<16x32xf32>, vector<16x32xf32> -> vector<16x32xf32>
    %31 = vector.broadcast %28 : vector<1x32xf32> to vector<16x32xf32>
    %32 = arith.addf %30, %31 : vector<16x32xf32>
    %cst_18 = arith.constant 0.000000e+00 : f32
    %33 = vector.broadcast %cst_18 : f32 to vector<16x32xf32>
    %34 = arith.maximumf %32, %33 : vector<16x32xf32>
    %c0_19 = arith.constant 0 : index
    %c32 = arith.constant 32 : index
    %35 = vector.load %arg5[%c0_19, %c32] : memref<32x64xf32, #tpu.memory_space<vmem>>, vector<32x32xf32>
    %c0_20 = arith.constant 0 : index
    %c32_21 = arith.constant 32 : index
    %36 = vector.load %arg6[%c0_20, %c32_21] : memref<1x64xf32, #tpu.memory_space<vmem>>, vector<1x32xf32>
    %cst_22 = arith.constant dense<0.000000e+00> : vector<16x32xf32>
    %37 = tpu.matmul %34, %35, %cst_22 {dimension_numbers = #tpu.dot_dimension_numbers<[1], [0], [0], [1], [0, 0, 1, 1], [], []>} : vector<16x32xf32>, vector<32x32xf32>, vector<16x32xf32> -> vector<16x32xf32>
    %cst_23 = arith.constant dense<0.000000e+00> : vector<16x32xf32>
    %38 = tpu.matmul %24, %37, %cst_23 {dimension_numbers = #tpu.dot_dimension_numbers<[1], [0], [0], [1], [0, 0, 1, 1], [], []>} : vector<16x16xf32>, vector<16x32xf32>, vector<16x32xf32> -> vector<16x32xf32>
    %39 = vector.broadcast %36 : vector<1x32xf32> to vector<16x32xf32>
    %40 = arith.addf %38, %39 : vector<16x32xf32>
    %cst_24 = arith.constant 0.000000e+00 : f32
    %41 = vector.broadcast %cst_24 : f32 to vector<16x32xf32>
    %42 = arith.maximumf %40, %41 : vector<16x32xf32>
    %c0_25 = arith.constant 0 : index
    %c0_26 = arith.constant 0 : index
    %c0_27 = arith.constant 0 : index
    %43 = vector.load %arg7[%c0_25, %c0_26, %c0_27] : memref<1x16x32xf32, #tpu.memory_space<vmem>>, vector<1x16x32xf32>
    %44 = vector.shape_cast %43 : vector<1x16x32xf32> to vector<16x32xf32>
    %45 = vector.shape_cast %42 : vector<16x32xf32> to vector<1x16x32xf32>
    tpu.vector_store %arg7[%c0_25, %c0_26, %c0_27], %45 {strides = array<i32>} : memref<1x16x32xf32, #tpu.memory_space<vmem>>, vector<1x16x32xf32>,
    return
  }
  func.func @transform_0(%arg0: i32) -> (i32, i32, i32) {
    %c0_i32 = arith.constant 0 : i32
    %c0_i32_0 = arith.constant 0 : i32
    %c0_i32_1 = arith.constant 0 : i32
    return %arg0, %c0_i32, %c0_i32_0 : i32, i32, i32
  }
  func.func @transform_1(%arg0: i32) -> (i32, i32, i32) {
    %c0_i32 = arith.constant 0 : i32
    %c0_i32_0 = arith.constant 0 : i32
    %c0_i32_1 = arith.constant 0 : i32
    return %arg0, %c0_i32, %c0_i32_0 : i32, i32, i32
  }
  func.func @transform_2(%arg0: i32) -> (i32, i32, i32) {
    %c0_i32 = arith.constant 0 : i32
    %c0_i32_0 = arith.constant 0 : i32
    %c0_i32_1 = arith.constant 0 : i32
    return %arg0, %c0_i32, %c0_i32_0 : i32, i32, i32
  }
  func.func @transform_3(%arg0: i32) -> (i32, i32, i32) {
    %c0_i32 = arith.constant 0 : i32
    %c0_i32_0 = arith.constant 0 : i32
    %c0_i32_1 = arith.constant 0 : i32
    return %arg0, %c0_i32, %c0_i32_0 : i32, i32, i32
  }
  func.func @transform_4(%arg0: i32) -> (i32, i32) {
    %c0_i32 = arith.constant 0 : i32
    %c0_i32_0 = arith.constant 0 : i32
    %c0_i32_1 = arith.constant 0 : i32
    return %c0_i32, %c0_i32_0 : i32, i32
  }
  func.func @transform_5(%arg0: i32) -> (i32, i32) {
    %c0_i32 = arith.constant 0 : i32
    %c0_i32_0 = arith.constant 0 : i32
    %c0_i32_1 = arith.constant 0 : i32
    return %c0_i32, %c0_i32_0 : i32, i32
  }
  func.func @transform_6(%arg0: i32) -> (i32, i32, i32) {
    %c0_i32 = arith.constant 0 : i32
    %c0_i32_0 = arith.constant 0 : i32
    %c0_i32_1 = arith.constant 0 : i32
    return %arg0, %c0_i32, %c0_i32_0 : i32, i32, i32
  }
}

</mosaic_0001>

<bundles_post_ra>
// kernel: _apply.1
= control target key start
LH: loop header
LB: loop body
LE: loop exit
PB: predicated region body
PF: predicated region fallthrough
CT: control target
= control target key end

     0   :  { %v27_v0 = vlaneseq  ;;  %s790_s0 = inlined_call_operand.vmem [shape: s32[1,1,48], index: 0, kind: input, shape index: {}]   ;;  %s791_s1 = inlined_call_operand.vmem [shape: s32[1,1,48], index: 1, kind: input, shape index: {}]   ;;  %s792_s2 = inlined_call_operand.vmem [shape: f32[1,1,48], index: 2, kind: input, shape index: {}]   ;;  %s793_s3 = inlined_call_operand.vmem [shape: f32[1,16,32], index: 3, kind: input, shape index: {}]   ;;  %s794_s4 = inlined_call_operand.vmem [shape: f32[32,64], index: 4, kind: input, shape index: {}]   ;;  %s795_s5 = inlined_call_operand.vmem [shape: f32[1,64], index: 5, kind: input, shape index: {}]   ;;  %s796_s6 = inlined_call_operand.hbm [shape: f32[1,16,32], index: 6, kind: output, shape index: {}]  }
   0x1   :  { %v532_v1 = vld [vmem:[%s791_s1] ss:$0 sm:$0xff] }
   0x2   :  { %11 = vsyncpa [#allocation3], 0  ;;  %v28_v2 = vshrl.u32 %v27_v0, 7  ;;  %v538_v3 = vld [vmem:[%s792_s2] ss:$0 sm:$0xff]  ;;  %v692_v5 = vmov 0.0  }
   0x3   :  { %vm58_vm1 = vcmask 392192   ;;  %v160_v12 = vld [vmem:[%s794_s4] sm:$0xff]  ;;  %v161_v13 = vld [vmem:[%s794_s4 + $0x8] sm:$0xff]  ;;  %v162_v17 = vld [vmem:[%s794_s4 + $0x10] sm:$0xff]  ;;  %vm165_vm5 = vcmask 261120   ;;  %vm253_vm7 = vcmask 130048  }
   0x4   :  { %vm34_vm0 = vcmp.eq.s32.totalorder %v28_v2, %v532_v1  ;;  %v29_v4 = vadd.s32 8, %v28_v2  ;;  %v625_v14 = vpack.c.bf16 %v161_v13, %v160_v12  ;;  %v535_v15 = vld [vmem:[%s790_s0] ss:$0 sm:$0xff]  ;;  %v163_v18 = vld [vmem:[%s794_s4 + $0x18] sm:$0xff]  ;;  %v159_v22 = vld [vmem:[%s793_s3 + $0x8] sm:$0xff]  ;;  %v654_v35 = vpack.i.bf16 %v161_v13, %v160_v12 }
   0x5   :  { %v533_v6 = vsel %vm34_vm0, 1.0, %v692_v5  ;;  %vm44_vm3 = vcmp.eq.s32.totalorder %v28_v2, %v535_v15  ;;  %v629_v19 = vpack.c.bf16 %v163_v18, %v162_v17  ;;  %v158_v21 = vld [vmem:[%s793_s3] sm:$0xff]  ;;  %vm620_vm6 = vmpackc.low %vm58_vm1, %vm58_vm1  ;;  %s693_s3 = smov 96   ;;  %v659_v36 = vpack.i.bf16 %v163_v18, %v162_v17 }
   0x6   :  { %v56_v7 = vmul.f32 %v538_v3, %v533_v6  ;;  %vm35_vm2 = vcmp.eq.s32.totalorder %v29_v4, %v532_v1  ;;  %626 = vmatprep.subr.bf16.mxu1 %v625_v14  ;;  %v536_v16 = vsel %vm44_vm3, 1.0, %v692_v5  ;;  %vm45_vm4 = vcmp.eq.s32.totalorder %v29_v4, %v535_v15  ;;  %591 = vmatprep.mubr.msk.f32.mxu1 %vm165_vm5, %v158_v21  ;;  %v545_v47 = vld [vmem:[%s795_s5] ss:$0 sm:$0xff]  ;;  %s694_s5 = smov [#allocation2]  }
   0x7   :  { %v534_v8 = vsel %vm35_vm2, 1.0, %v692_v5  ;;  %628 = vmatpush3.bf16.msra.mxu1 %v625_v14  ;;  %v537_v20 = vsel %vm45_vm4, 1.0, %v692_v5  ;;  %655 = vrot.lane.b32.xlu1 %v654_v35, %s693_s3  ;;  %s521_s13 = sshll.u32 %s694_s5, 4  ;;  %s522_s13 = int_to_ptr.vmem [resolvable:$true] %s521_s13 }
   0x8   :  { %v59_v9 = vsel %vm58_vm1, %v56_v7, 0.0  ;;  %v57_v10 = vmul.f32 %v538_v3, %v534_v8  ;;  %630 = vmatprep.subr.bf16.mxu1 %v629_v19  ;;  %s668_s14 = scalar_lea.vmem %s522_s13, 256  ;;  %p673_p1 = scmp.lt.s32.totalorder %s522_s13, %s522_s13 }
   0x9   :  { %60 = vadd.xlane.f32.xlu0 %v59_v9  ;;  %p669_p0 = scmp.ne.s32.totalorder %s522_s13, %s668_s14  ;;  %p674_p2 = scmp.lt.s32.totalorder %s668_s14, %s668_s14 }
   0xa   :  { %v62_v11 = vsel %vm58_vm1, %v57_v10, 0.0 }
   0xb   :  { %632 = vmatpush3.bf16.msra.mxu1 %v629_v19  ;;  %660 = vrot.lane.b32.xlu1 %v659_v36, %s693_s3  ;;  %p675_p3 = por %p674_p2, %p673_p1 }
   0xd   :  { %63 = vadd.xlane.f32.xlu0 %v62_v11  ;;  %p676_p4 = pnand %p675_p3, %p669_p0 }
   0xe   :  { %592 = vmatmul.mubr.msk.f32.vlgmr.msra.gmra.mrb[0].mxu1 %vm165_vm5, %v159_v22 }
  0x23   :  { %434 = vrot.lane.b32.xlu0 %v545_v47, %s693_s3 }
  0x79   :  { %v656_v37 = vpop.permute.xlu1 %655 }
  0x7a   :  { %v658_v38 = vunpack.i.h.bf16 %v656_v37  ;;  %v657_v39 = vunpack.i.l.bf16 %v656_v37 }
  0x7c   :  { %v637_v40 = vpack.c.bf16 %v658_v38, %v657_v39 }
  0x7d   :  { %v661_v41 = vpop.permute.xlu1 %660 }
  0x7e   :  { %v663_v42 = vunpack.i.h.bf16 %v661_v41  ;;  %v662_v43 = vunpack.i.l.bf16 %v661_v41  ;;  %638 = vmatprep.subr.bf16.mxu1 %v637_v40 }
  0x7f   :  { %640 = vmatpush3.bf16.msra.mxu1 %v637_v40 }
  0x80   :  { %v641_v44 = vpack.c.bf16 %v663_v42, %v662_v43 }
  0x82   :  { %642 = vmatprep.subr.bf16.mxu1 %v641_v44 }
  0x83   :  { %644 = vmatpush3.bf16.msra.mxu1 %v641_v44 }
  0x96   :  { %v61_v23 = vpop.xlane.xlu0 %60 }
  0x97   :  { %664 = vrsqrt.f32 %v61_v23 }
  0x9a   :  { %v64_v24 = vpop.xlane.xlu0 %63 }
  0x9b   :  { %666 = vrsqrt.f32 %v64_v24 }
  0x9e   :  { %v435_v57 = vpop.permute.xlu0 %434 }
  0xa1   :  { %v665_v25 = vpop.eup %664 }
  0xa2   :  { %v67_v26 = vmul.f32 %v665_v25, %v56_v7  ;;  %v69_v28 = vmul.f32 %v665_v25, %v536_v16 }
  0xa4   :  { %580 = vmatprep.mubr.msk.f32.mxu0 %vm58_vm1, %v67_v26 }
  0xa5   :  { %v667_v27 = vpop.eup %666 }
  0xa6   :  { %v70_v29 = vmul.f32 %v667_v27, %v537_v20  ;;  %v68_v31 = vmul.f32 %v667_v27, %v57_v10 }
  0xa8   :  { %v619_v30 = vpack.c.bf16 %v70_v29, %v69_v28 }
  0xaa   :  { %621 = vmatprep.subr.msk.bf16.mxu0 %vm620_vm6, %v619_v30 }
  0xab   :  { %624 = vmatpush3.bf16.xpose.msk.msra.mxu0 %vm620_vm6, %v619_v30 }
  0xb2   :  { %581 = vmatmul.mubr.msk.f32.vlgmr.msra.gmra.mrb[0].mxu0 %vm58_vm1, %v68_v31 }
  0xe1   :  { %v593_v32 = vpop.f32.mrb[0].mxu1 }
  0xe2   :  { %v238_v33 = vpop.f32.mrb[1].mxu1 }
  0xe3   :  { %v633_v34 = vpack.c.bf16 %v593_v32, %v238_v33 }
  0xe5   :  { %634 = vmatprep.subr.bf16.mxu0 %v633_v34 }
  0xe6   :  { %636 = vmatpush3.bf16.msra.mxu0 %v633_v34 }
 0x185   :  { %v582_v45 = vpop.f32.mrb[0].mxu0 }
 0x186   :  { %v149_v46 = vpop.f32.mrb[1].mxu0 }
 0x187   :  { %598 = vmatprep.mubr.msk.f32.mxu0 %vm253_vm7, %v149_v46 }
 0x188   :  { %599 = vmatmul.mubr.msk.f32.vlgmr.msra.gmra.mrb[2].mxu0 %vm253_vm7, %v582_v45 }
 0x189   :  { %616 = vmatprep.mubr.msk.f32.mxu0 %vm253_vm7, %v149_v46 }
 0x25b   :  { %v600_v48 = vpop.f32.mrb[2].mxu0 }
 0x25c   :  { %v332_v49 = vadd.f32 %v600_v48, %v545_v47  ;;  %v326_v50 = vpop.f32.mrb[3].mxu0 }
 0x25d   :  { %v327_v51 = vadd.f32 %v545_v47, %v326_v50 }
 0x25e   :  { %v336_v53 = vmax.f32 %v332_v49, 0.0 }
 0x25f   :  { %v335_v52 = vmax.f32 %v327_v51, 0.0 }
 0x261   :  { %609 = vmatprep.mubr.msk.f32.mxu1 %vm165_vm5, %v335_v52 }
 0x262   :  { %610 = vmatmul.mubr.msk.f32.vlgmr.msra.gmra.mrb[2].mxu1 %vm165_vm5, %v336_v53 }
 0x335   :  { %v611_v54 = vpop.f32.mrb[2].mxu1 }
 0x336   :  { %v425_v55 = vpop.f32.mrb[3].mxu1 }
 0x337   :  { %v645_v56 = vpack.c.bf16 %v611_v54, %v425_v55 }
 0x339   :  { %646 = vmatprep.subr.bf16.mxu0 %v645_v56 }
 0x33a   :  { %648 = vmatpush3.bf16.msra.mxu0 %v645_v56 }
 0x33d   :  { %617 = vmatmul.mubr.msk.f32.vlgmr.msra.gmra.mrb[4].mxu0 %vm253_vm7, %v582_v45 }
 0x410   :  { %v618_v58 = vpop.f32.mrb[4].mxu0 }
 0x411   :  { %v509_v59 = vadd.f32 %v618_v58, %v435_v57  ;;  %v503_v60 = vpop.f32.mrb[5].mxu0 }
 0x412   :  { %v504_v61 = vadd.f32 %v503_v60, %v435_v57 }
 0x413   :  { %v513_v62 = vmax.f32 %v509_v59, 0.0 }
 0x414   :  { %v512_v63 = vmax.f32 %v504_v61, 0.0 }
 0x415   :  { %515 = vst.msk [vmem:[#allocation2 + $0x8] sm:$0xff] %vm165_vm5, %v513_v62 }
 0x416   :  { %514 = vst.msk [vmem:[#allocation2] sm:$0xff] %vm165_vm5, %v512_v63 }
 0x417   :  { %679 = shalt.err (!%p676_p4)
}
 0x418   :  { %s680_s17 = scalar_lea.hbm %s796_s6, 256 }
 0x419   :  { %p681_p5 = scmp.ne.s32.totalorder %s796_s6, %s680_s17  ;;  %p684_p6 = scmp.lt.u32.totalorder %s680_s17, %s796_s6 }
 0x41b   :  { %p686_p7 = pnand %p684_p6, %p681_p5 }
 0x41d   :  { %689 = shalt.err (!%p686_p7)
}
 0x41e   :  { %s695_s22 = smov 128   ;;  %s696_s23 = smov 8  }
 0x41f   :  { %527 = dma.vmem_to_hbm [thread:$0]  %s522_s13, 256, %s796_s6, [#allocation3], %s695_s22, %s695_s22, %s696_s23  }
 0x420   :  { %690 = dma.done.wait [#allocation3], 256  }
 0x421   :  { %691 = vsyncadd [#allocation3], 4294967040 }
 0x422   :  { %531 = vsyncpa [#allocation3], 1 }

</bundles_post_ra>
